<compile_context>
chip_gen: v6e
topology: v6e:2x2x1
jax: 0.10.0
libtpu: 0.0.40
codegen_flags: <defaults>
</compile_context>

<pallas_src>
import types
from functools import lru_cache

import numpy as np
import jax
import jax.numpy as jnp
from jax.experimental import pallas as pl
from jax.experimental.pallas import tpu as pltpu


def _round_up(x, m):
    return int(-(-x // m) * m)


# ----------------------------------------------------------------------------
# Pallas kernel: thresholded token similarity -> int8 adjacency tile
# ----------------------------------------------------------------------------
def _adj_kernel(thr_ref, row_ref, col_ref, adj_ref):
    thr = thr_ref[0, 0]                                   # SMEM scalar (logit threshold)
    # (TM, D) x (TN, D) contracted on the feature axis -> (TM, TN), no transpose.
    dot = jax.lax.dot_general(
        row_ref[...], col_ref[...],
        dimension_numbers=(((1,), (1,)), ((), ())),
        preferred_element_type=jnp.float32)
    adj_ref[...] = (dot >= thr).astype(jnp.int8)


@lru_cache(maxsize=None)
def _build_adj_call(n_pad, d, tm, tn, col_resident):
    """Cache the jitted pallas_call per shape bucket (kills per-n recompiles)."""
    smem_spec = pl.BlockSpec(memory_space=pltpu.MemorySpace.SMEM)
    if col_resident:
        # 1-D grid over row blocks; RHS stays resident in VMEM (constant index).
        grid = (n_pad // tm,)
        in_specs = [
            smem_spec,
            pl.BlockSpec((tm, d), lambda i: (i, 0)),          # row block
            pl.BlockSpec((n_pad, d), lambda i: (0, 0)),        # resident col operand
        ]
        out_specs = pl.BlockSpec((tm, n_pad), lambda i: (i, 0))  # lane-dense store
        dims = ("parallel",)
    else:
        grid = (n_pad // tm, n_pad // tn)
        in_specs = [
            smem_spec,
            pl.BlockSpec((tm, d), lambda i, j: (i, 0)),
            pl.BlockSpec((tn, d), lambda i, j: (j, 0)),
        ]
        out_specs = pl.BlockSpec((tm, tn), lambda i, j: (i, j))
        dims = ("parallel", "parallel")

    call = pl.pallas_call(
        _adj_kernel,
        out_shape=jax.ShapeDtypeStruct((n_pad, n_pad), jnp.int8),
        grid_spec=pl.GridSpec(grid=grid, in_specs=in_specs, out_specs=out_specs),
        compiler_params=pltpu.CompilerParams(dimension_semantics=dims),
    )
    return jax.jit(call)


def token_adjacency(tokens, inner_prune, *, max_tile=512):
    """Returns (padded int8 adjacency (n_pad, n_pad), n).

    adj[i, j] = 1 if sigmoid(<t_i, t_j>) >= inner_prune else 0 for i, j < n.
    Padded (zero) rows have dot == 0 -> sigmoid == 0.5, so callers MUST slice
    to [:n, :n] (done host-side) before extracting edges.
    max_tile=512 is safe against default scoped VMEM on v5e/v6e/v7x.
    """
    tokens = jnp.asarray(tokens, jnp.bfloat16)            # bf16 MXU inputs, f32 acc
    n, d = tokens.shape

    # Fold sigmoid into the threshold: sigmoid(x) >= p  <=>  x >= log(p/(1-p)).
    p = float(inner_prune)
    if p <= 0.0:
        thr_val = -np.inf                                  # torch: all ones
    elif p >= 1.0:
        thr_val = np.inf                                   # torch: all zeros
    else:
        thr_val = float(np.log(p) - np.log1p(-p))
    thresh = jnp.full((1, 1), thr_val, jnp.float32)

    if n <= max_tile:
        # Bucket to multiples of 128: lane-dense int8 stores + compile-cache hits.
        n_pad = _round_up(max(n, 128), 128)
        tm = max(n_pad // 2, 64)                           # >=2 parallel blocks (v7x megacore)
        tn = n_pad
        col_resident = True
    else:
        n_pad = _round_up(n, max_tile)
        tm = tn = max_tile
        col_resident = False

    t_p = jnp.pad(tokens, ((0, n_pad - n), (0, 0)))        # single pad, no .at[].set copy
    call = _build_adj_call(n_pad, d, tm, tn, col_resident)
    return call(thresh, t_p, t_p), n


def _edge_index_from_adj(adj_padded, n):
    # TODO(synk): torch.nonzero is dynamic-shape; edge extraction stays host-side.
    adj_np = np.asarray(jax.device_get(adj_padded))[:n, :n]   # numpy view slice (free)
    rows, cols = np.nonzero(adj_np)
    return np.stack([rows, cols], axis=0).astype(np.int64)


# ----------------------------------------------------------------------------
# Deterministic parameter init (kaiming_uniform, leaky_relu a=0.01, fan_in)
# ----------------------------------------------------------------------------
def kaiming_uniform(key, shape, a=0.01):
    fan_in = shape[1]
    gain = np.sqrt(2.0 / (1.0 + a * a))
    bound = gain * np.sqrt(3.0 / fan_in)
    return jax.random.uniform(key, shape, jnp.float32, -bound, bound)


# ----------------------------------------------------------------------------
# Module re-implementation
# ----------------------------------------------------------------------------
class QueryPromptAugmentedPallas:
    def __init__(self, token_dim, token_num, virtual_num,
                 cross_prune=0.1, inner_prune=0.01, key=None):
        key = jax.random.PRNGKey(0) if key is None else key
        k1, k2 = jax.random.split(key)
        self.token_list = kaiming_uniform(k1, (token_num, token_dim))   # (token_num, D)
        self.vir_list = kaiming_uniform(k2, (virtual_num, token_dim))   # (virtual_num, D)
        self.inner_prune = inner_prune
        self.cross_prune = cross_prune   # stored (unused), mirrors the PyTorch module

    # attr_view: rows [0:len(attr_index)] = gathered tokens, the next
    # virtual_num rows stay zero (mirrors the PyTorch pre-allocated buffer),
    # then vir_list is appended.
    def _attr_view(self, attr_index):
        gathered = self.token_list[jnp.asarray(attr_index, jnp.int32)]
        zero_rows = jnp.zeros((self.vir_list.shape[0], self.token_list.shape[1]),
                              jnp.float32)
        token_list4query = jnp.concatenate([gathered, zero_rows, self.vir_list], axis=0)
        adj, n = token_adjacency(token_list4query, self.inner_prune)
        edge_index = _edge_index_from_adj(adj, n)
        return token_list4query, edge_index

    def _vir_view(self):
        zero_rows = jnp.zeros_like(self.vir_list)
        token_list4query = jnp.concatenate([zero_rows, self.vir_list], axis=0)
        adj, n = token_adjacency(token_list4query, self.inner_prune)
        edge_index = _edge_index_from_adj(adj, n)
        return token_list4query, edge_index

    def inner_structure_update(self, attr_index):
        if np.asarray(attr_index).shape[0] != 0:
            return self._attr_view(attr_index)
        return self._vir_view()

    def forward(self, queries):
        x, edge_index = queries.x, np.asarray(queries.edge_index, np.int64)
        x_attr, attr_index = np.asarray(queries.x_attr), np.asarray(queries.attr_index)
        query = np.asarray(queries.query)

        pg_x, inner_edge_index = self.inner_structure_update(attr_index)
        # Mirrors torch `len(pg.edge_index) != 0` (first dim of the (2, E) tensor).
        has_inner = inner_edge_index.shape[0] != 0
        if has_inner:
            inner_edge_type = 2 * np.ones((1, inner_edge_index.shape[1]), np.int64)

        token_num = int(pg_x.shape[0])
        edge_index = edge_index + token_num
        edge_type = np.zeros((1, edge_index.shape[1]), np.int64)

        # cross edges (host-side integer bookkeeping, as in the PyTorch loops)
        cei = []
        if x_attr.shape[0] != 0:
            for i in range(x_attr.shape[1]):
                for n in np.nonzero(x_attr[:, i])[0]:
                    cei.append((i, int(n) + token_num))
        for n in query:
            for j in range(attr_index.shape[0], token_num):
                cei.append((j, int(n) + token_num))
        cross_edged_index = np.ones((2, len(cei)), np.int64)
        for i, e in enumerate(cei):
            cross_edged_index[0][i], cross_edged_index[1][i] = e[0], e[1]
        cross_edge_type = np.ones((1, cross_edged_index.shape[1]), np.int64)

        if has_inner:
            edge_index = np.concatenate(
                [edge_index, cross_edged_index, inner_edge_index], axis=1)
            edge_type = np.concatenate(
                [edge_type, cross_edge_type, inner_edge_type], axis=1)
        else:
            edge_index = np.concatenate([edge_index, cross_edged_index], axis=1)
            edge_type = np.concatenate([edge_type, cross_edge_type], axis=1)

        x_out = jnp.concatenate([pg_x, jnp.asarray(x, jnp.float32)], axis=0)
        data = types.SimpleNamespace(
            x=x_out, edge_index=edge_index, edge_attr=edge_type.squeeze())
        return data, token_num


# ----------------------------------------------------------------------------
if __name__ == "__main__":
    key = jax.random.PRNGKey(0)
    k_mod, k_x, k_e, k_a = jax.random.split(key, 4)

    token_dim, token_num, virtual_num = 32, 8, 2
    num_nodes, num_graph_edges, num_attr_cols = 6, 10, 3

    model = QueryPromptAugmentedPallas(
        token_dim, token_num, virtual_num,
        cross_prune=0.1, inner_prune=0.01, key=k_mod)

    queries = types.SimpleNamespace(
        x=jax.random.normal(k_x, (num_nodes, token_dim), jnp.float32),
        edge_index=np.asarray(
            jax.random.randint(k_e, (2, num_graph_edges), 0, num_nodes)),
        x_attr=np.asarray(
            jax.random.bernoulli(k_a, 0.4, (num_nodes, num_attr_cols))).astype(np.int64),
        attr_index=np.array([0, 2, 5], np.int64),
        query=np.array([1, 3], np.int64),
    )

    data, tok_n = model.forward(queries)
    jax.block_until_ready(data.x)

    # Also exercise the vir_view (empty attr_index) path once.
    queries_empty = types.SimpleNamespace(
        x=queries.x, edge_index=queries.edge_index, x_attr=queries.x_attr,
        attr_index=np.zeros((0,), np.int64), query=queries.query)
    data2, tok_n2 = model.forward(queries_empty)
    jax.block_until_ready(data2.x)

    assert data.x.shape == (tok_n + num_nodes, token_dim)
    assert data.edge_index.shape[0] == 2
    assert data.edge_attr.shape[0] == data.edge_index.shape[1]
    assert data2.x.shape == (tok_n2 + num_nodes, token_dim)
    assert data2.edge_attr.shape[0] == data2.edge_index.shape[1]
    print("KERNEL_OK")
</pallas_src>

<mosaic_0001>
module attributes {stable_mosaic.version = 11 : i64} {
  func.func @_adj_kernel(%arg0: i32, %arg1: memref<1x1xf32, #tpu.memory_space<smem>>, %arg2: memref<64x32xbf16, #tpu.memory_space<vmem>>, %arg3: memref<128x32xbf16, #tpu.memory_space<vmem>>, %arg4: memref<64x128xi8, #tpu.memory_space<vmem>>) attributes {dimension_semantics = [#tpu.dimension_semantics<parallel>], iteration_bounds = array<i64: 2>, scalar_prefetch = 0 : i64, scratch_operands = 0 : i64, tpu.core_type = #tpu.core_type<tc>, window_params = [{transform_indices = @transform_0, window_bounds = array<i64: 1, 1>}, {transform_indices = @transform_1, window_bounds = array<i64: 64, 32>}, {pipeline_mode = #tpu.pipeline_mode<synchronous>, transform_indices = @transform_2, window_bounds = array<i64: 128, 32>}, {transform_indices = @transform_3, window_bounds = array<i64: 64, 128>}]} {
    %c0 = arith.constant 0 : index
    %c0_0 = arith.constant 0 : index
    %0 = memref.load %arg1[%c0, %c0_0] : memref<1x1xf32, #tpu.memory_space<smem>>
    %c0_1 = arith.constant 0 : index
    %c0_2 = arith.constant 0 : index
    %1 = vector.load %arg2[%c0_1, %c0_2] : memref<64x32xbf16, #tpu.memory_space<vmem>>, vector<64x32xbf16>
    %c0_3 = arith.constant 0 : index
    %c0_4 = arith.constant 0 : index
    %2 = vector.load %arg3[%c0_3, %c0_4] : memref<128x32xbf16, #tpu.memory_space<vmem>>, vector<128x32xbf16>
    %cst = arith.constant dense<0.000000e+00> : vector<64x128xf32>
    %3 = tpu.matmul %1, %2, %cst {dimension_numbers = #tpu.dot_dimension_numbers<[1], [1], [0], [0], [0, 0, 1, 0], [], []>} : vector<64x32xbf16>, vector<128x32xbf16>, vector<64x128xf32> -> vector<64x128xf32>
    %4 = vector.broadcast %0 : f32 to vector<64x128xf32>
    %5 = arith.cmpf oge, %3, %4 : vector<64x128xf32>
    %6 = arith.extui %5 : vector<64x128xi1> to vector<64x128xi8>
    %c0_5 = arith.constant 0 : index
    %c0_6 = arith.constant 0 : index
    %7 = vector.load %arg4[%c0_5, %c0_6] : memref<64x128xi8, #tpu.memory_space<vmem>>, vector<64x128xi8>
    tpu.vector_store %arg4[%c0_5, %c0_6], %6 {strides = array<i32>} : memref<64x128xi8, #tpu.memory_space<vmem>>, vector<64x128xi8>,
    return
  }
  func.func @transform_0(%arg0: i32) -> (i32, i32) {
    %c0_i32 = arith.constant 0 : i32
    %c0_i32_0 = arith.constant 0 : i32
    %c0_i32_1 = arith.constant 0 : i32
    return %c0_i32, %c0_i32_0 : i32, i32
  }
  func.func @transform_1(%arg0: i32) -> (i32, i32) {
    %c0_i32 = arith.constant 0 : i32
    %c0_i32_0 = arith.constant 0 : i32
    return %arg0, %c0_i32 : i32, i32
  }
  func.func @transform_2(%arg0: i32) -> (i32, i32) {
    %c0_i32 = arith.constant 0 : i32
    %c0_i32_0 = arith.constant 0 : i32
    %c0_i32_1 = arith.constant 0 : i32
    return %c0_i32, %c0_i32_0 : i32, i32
  }
  func.func @transform_3(%arg0: i32) -> (i32, i32) {
    %c0_i32 = arith.constant 0 : i32
    %c0_i32_0 = arith.constant 0 : i32
    return %arg0, %c0_i32 : i32, i32
  }
}

</mosaic_0001>

<bundles_post_ra>
// kernel: tpu_custom_call.1
= control target key start
LH: loop header
LB: loop body
LE: loop exit
PB: predicated region body
PF: predicated region fallthrough
CT: control target
= control target key end

     0   :  { %s867_s0 = inlined_call_operand.<no memory space> [shape: f32[1,1], index: 0, kind: input, shape index: {}]   ;;  %s868_s1 = inlined_call_operand.vmem [shape: bf16[128,32], index: 1, kind: input, shape index: {}]   ;;  %s869_s2 = inlined_call_operand.vmem [shape: bf16[128,32], index: 2, kind: input, shape index: {}]   ;;  %s870_s3 = inlined_call_operand.hbm [shape: s8[128,128], index: 3, kind: output, shape index: {}]  }
   0x1   :  { %8 = sst [smem:[#allocation2]] %s867_s0 }
   0x2   :  { %9 = vsyncpa [#allocation4], 0 }
   0x3   :  { %11 = vsyncpa [#allocation4 + $0x1], 0  ;;  %s698_s14 = smov 0   ;;  %s700_s15 = smov 0  }
   0x4   :  { %s702_s16 = smov 0   ;;  %s704_s17 = smov 0  }
   0x5 LB: > { %s719_s0 = sadd.s32 4294967295, %s669_s17   ;;  %s458_s18 = sadd.s32 4294967294, %s669_s17   ;;  %s669_s17 = sphi %s704_s17, %s878_s17   ;;  %s665_s16 = sphi %s702_s16, %s877_s16   ;;  %s661_s15 = sphi %s700_s15, %s876_s15   ;;  %s657_s14 = sphi %s698_s14, %s875_s14  }
   0x6   : > { %s723_s19 = sadd.s32 1, %s669_s17   ;;  %s92_s20 = sadd.s32 1, %s665_s16 }
   0x7   : > { %s89_s21 = ssub.s32 %s669_s17, %s723_s19  ;;  %p102_p0 = scmp.ne.s32.totalorder %s665_s16, %s661_s15 }
   0x8   : > { %p90_p1 = scmp.eq.s32.totalorder %s89_s21, 0  ;;  %p103_p2 = scmp.eq.s32.totalorder %s719_s0, 1 }
   0x9   : > { %p108_p3 = scmp.ne.s32.totalorder %s661_s15, %s657_s14  ;;  %p109_p4 = scmp.eq.s32.totalorder %s458_s18, 1 }
   0xa   : > { %s734_s22 = scalar_select %p90_p1, %s665_s16, %s92_s20  }
   0xb   : > { %p736_p5 = por %p103_p2, %p102_p0  ;;  %p740_p6 = por %p109_p4, %p108_p3 }
   0xc   : > { %p461_p7 = scmp.ge.s32.totalorder %s669_s17, 1  ;;  %p142_p8 = scmp.lt.s32.totalorder %s669_s17, 3 }
   0xe   : > { %p143_p9 = pnand %p461_p7, %p142_p8 }
   0xf   : > { %s463_s29 = sshll.u32 (!%p143_p9), %s719_s0, 3  ;;  %s176_s27 = sld [smem:[#allocation2]] (!%p143_p9) }
  0x10   : > { %146 = sbr.rel (%p143_p9) target bundleno = 305 (0x131), region = 32  ;;  %p167_p10 = scmp.lt.s32.totalorder (!%p143_p9), %s463_s29, 15 }
  0x11   : > { %s163_s28 = sand.u32 (!%p143_p9), 1, %s661_s15   ;;  %s672_s10 = smov (!%p143_p9), [#allocation3]  }
  0x12   : > { %s613_s11 = sshll.u32 (!%p143_p9), %s672_s10, 4  ;;  %s614_s11 = int_to_ptr.vmem [resolvable:$false] %s613_s11 }
  0x13   : > { %s615_s12 = scalar_lea.vmem (!%p143_p9), %s614_s11, 512 }
  0x15   : > { %v597_v0 = vld [vmem:[%s869_s2 + $0x38] sm:$0xff]   ;;  %vm261_vm0 = vcmask 261120   ;;  %v598_v1 = vld [vmem:[%s869_s2 + $0x30] sm:$0xff]   ;;  %v599_v4 = vld [vmem:[%s869_s2 + $0x28] sm:$0xff]   ;;  %s880_s29 = smov (!%p167_p10, %s463_s29), 15  ;;  %v363_v22 = vstv %s176_s27  ;;  %v671_v30 = vmov 0  }
  0x16   : > { %539 = vmatprep.subr.msk.bf16.mxu0 %vm261_vm0, %v597_v0  ;;  %540 = vmatprep.subr.msk.bf16.mxu1 %vm261_vm0, %v597_v0  ;;  %v296_v2 = vsel %vm261_vm0, %v597_v0, 0  ;;  %v293_v3 = vsel %vm261_vm0, %v598_v1, 0  ;;  %s464_s5 = sshll.u32 %s880_s29, 2  ;;  %v290_v7 = vsel %vm261_vm0, %v599_v4, 0  ;;  %v600_v8 = vld [vmem:[%s869_s2 + $0x20] sm:$0xff]   ;;  %v601_v10 = vld [vmem:[%s869_s2 + $0x18] sm:$0xff]  }
  0x17   : > { %500 = vmatpush3.bf16.xpose.msra.mxu0 %v296_v2  ;;  %531 = vmatpush3.bf16.xpose.msra.mxu1 %v296_v2  ;;  %s767_s8 = scalar_lea.vmem %s868_s1, %s464_s5  ;;  %v287_v9 = vsel %vm261_vm0, %v600_v8, 0  ;;  %v284_v11 = vsel %vm261_vm0, %v601_v10, 0  ;;  %v602_v12 = vld [vmem:[%s869_s2 + $0x10] sm:$0xff]   ;;  %v603_v14 = vld [vmem:[%s869_s2 + $0x8] sm:$0xff]   ;;  %v604_v16 = vld [vmem:[%s869_s2] sm:$0xff]   ;;  %s462_s29 = sshll.u32 %s163_s28, 4 }
  0x18   : > { %541 = vmatprep.subr.msk.bf16.mxu0 %vm261_vm0, %v598_v1  ;;  %542 = vmatprep.subr.msk.bf16.mxu1 %vm261_vm0, %v598_v1  ;;  %v605_v5 = vld [vmem:[%s767_s8] sm:$0xff]   ;;  %v606_v6 = vld [vmem:[%s767_s8 + $0x10] sm:$0xff]   ;;  %v281_v13 = vsel %vm261_vm0, %v602_v12, 0  ;;  %v278_v15 = vsel %vm261_vm0, %v603_v14, 0  ;;  %v275_v17 = vsel %vm261_vm0, %v604_v16, 0  ;;  %v607_v18 = vld [vmem:[%s767_s8 + $0x8] sm:$0xff]  }
  0x19   : > { %515 = vmatprep.mubr.msk.bf16.mxu0 %vm261_vm0, %v605_v5  ;;  %519 = vmatprep.mubr.msk.bf16.mxu1 %vm261_vm0, %v606_v6  ;;  %v608_v19 = vld [vmem:[%s767_s8 + $0x18] sm:$0xff]   ;;  %s165_s30 = scalar_lea.vmem [#allocation3], %s462_s29  ;;  %s486_s5 = sshll.u32 %s719_s0, 8 }
  0x1a   : > { %s396_s4 = sshll.u32 %s165_s30, 4  ;;  %s821_s8 = scalar_lea.hbm %s870_s3, %s486_s5  ;;  %s816_s4 = int_to_ptr.vmem [resolvable:$true] %s396_s4 }
  0x1b   : > { %s827_s0 = scalar_lea.sflag [#allocation4], %s163_s28  ;;  %s609_s9 = scalar_lea.vmem %s816_s4, 256 }
  0x1c   : > { %p610_p11 = scmp.ne.s32.totalorder %s816_s4, %s609_s9  ;;  %p616_p0 = scmp.lt.s32.totalorder %s816_s4, %s614_s11 }
  0x1d   : > { %p617_p1 = scmp.lt.s32.totalorder %s615_s12, %s609_s9 }
  0x1e   : > { %p611_p12 = pnand %p610_p11, %p736_p5 }
  0x1f   : > { %502 = vmatpush3.bf16.xpose.msra.mxu0 %v293_v3  ;;  %532 = vmatpush3.bf16.xpose.msra.mxu1 %v293_v3  ;;  %p618_p2 = por %p617_p1, %p616_p0 }
  0x20   : > { %543 = vmatprep.subr.msk.bf16.mxu0 %vm261_vm0, %v599_v4  ;;  %544 = vmatprep.subr.msk.bf16.mxu1 %vm261_vm0, %v599_v4  ;;  %p612_p13 = pneg %p611_p12 }
  0x22   : > { %p619_p3 = pnand %p618_p2, %p612_p13 }
  0x27   : > { %504 = vmatpush3.bf16.xpose.msra.mxu0 %v290_v7  ;;  %533 = vmatpush3.bf16.xpose.msra.mxu1 %v290_v7 }
  0x28   : > { %545 = vmatprep.subr.msk.bf16.mxu0 %vm261_vm0, %v600_v8  ;;  %546 = vmatprep.subr.msk.bf16.mxu1 %vm261_vm0, %v600_v8 }
  0x2f   : > { %506 = vmatpush3.bf16.xpose.msra.mxu0 %v287_v9  ;;  %534 = vmatpush3.bf16.xpose.msra.mxu1 %v287_v9 }
  0x30   : > { %547 = vmatprep.subr.msk.bf16.mxu0 %vm261_vm0, %v601_v10  ;;  %548 = vmatprep.subr.msk.bf16.mxu1 %vm261_vm0, %v601_v10 }
  0x37   : > { %508 = vmatpush3.bf16.xpose.msra.mxu0 %v284_v11  ;;  %535 = vmatpush3.bf16.xpose.msra.mxu1 %v284_v11 }
  0x38   : > { %549 = vmatprep.subr.msk.bf16.mxu0 %vm261_vm0, %v602_v12  ;;  %550 = vmatprep.subr.msk.bf16.mxu1 %vm261_vm0, %v602_v12 }
  0x3f   : > { %510 = vmatpush3.bf16.xpose.msra.mxu0 %v281_v13  ;;  %536 = vmatpush3.bf16.xpose.msra.mxu1 %v281_v13 }
  0x40   : > { %551 = vmatprep.subr.msk.bf16.mxu0 %vm261_vm0, %v603_v14  ;;  %552 = vmatprep.subr.msk.bf16.mxu1 %vm261_vm0, %v603_v14 }
  0x47   : > { %512 = vmatpush3.bf16.xpose.msra.mxu0 %v278_v15  ;;  %537 = vmatpush3.bf16.xpose.msra.mxu1 %v278_v15 }
  0x48   : > { %553 = vmatprep.subr.msk.bf16.mxu0 %vm261_vm0, %v604_v16  ;;  %554 = vmatprep.subr.msk.bf16.mxu1 %vm261_vm0, %v604_v16 }
  0x4f   : > { %514 = vmatpush3.bf16.xpose.msra.mxu0 %v275_v17  ;;  %538 = vmatpush3.bf16.xpose.msra.mxu1 %v275_v17 }
  0x56   : > { %516 = vmatmul.mubr.msk.bf16.vlgmr.msra.gmra.mxu0 %vm261_vm0, %v607_v18  ;;  %520 = vmatmul.mubr.msk.bf16.vlgmr.msra.gmra.mxu1 %vm261_vm0, %v608_v19 }
 0x116   : > { %v517_v20 = vpop.f32.mrf.mxu0  ;;  %v521_v21 = vpop.f32.mrf.mxu1 }
 0x117   : > { %vm366_vm1 = vcmp.ge.f32.partialorder %v517_v20, %v363_v22  ;;  %vm370_vm4 = vcmp.ge.f32.partialorder %v521_v21, %v363_v22 }
 0x118   : > { %v332_v23 = vpop.f32.mrf.mxu0  ;;  %v348_v24 = vpop.f32.mrf.mxu1 }
 0x119   : > { %vm364_vm6 = vcmp.ge.f32.partialorder %v332_v23, %v363_v22  ;;  %vm368_vm11 = vcmp.ge.f32.partialorder %v348_v24, %v363_v22 }
 0x11a   : > { %v518_v25 = vpop.f32.mrf.mxu0  ;;  %v522_v26 = vpop.f32.mrf.mxu1 }
 0x11b   : > { %vm367_vm2 = vcmp.ge.f32.partialorder %v518_v25, %v363_v22  ;;  %vm371_vm3 = vcmp.ge.f32.partialorder %v522_v26, %v363_v22 }
 0x11c   : > { %vm373_vm5 = vmpackc.low %vm367_vm2, %vm366_vm1  ;;  %v335_v27 = vpop.f32.mrf.mxu0  ;;  %v351_v28 = vpop.f32.mrf.mxu1 }
 0x11d   : > { %vm811_vm7 = vmpackc.low %vm371_vm3, %vm370_vm4  ;;  %vm365_vm8 = vcmp.ge.f32.partialorder %v335_v27, %v363_v22  ;;  %vm369_vm9 = vcmp.ge.f32.partialorder %v351_v28, %v363_v22 }
 0x11e   : > { %vm372_vm10 = vmpackc.low %vm365_vm8, %vm364_vm6 }
 0x11f   : > { %vm374_vm12 = vmpackc.even %vm373_vm5, %vm372_vm10 }
 0x120   : > { %v378_v31 = vsel %vm374_vm12, 16843009, %v671_v30  ;;  %vm375_vm13 = vmpackc.low %vm369_vm9, %vm368_vm11 }
 0x121   : > { %380 = vst [vmem:[%s165_s30] sm:$0xff] %v378_v31  ;;  %vm377_vm14 = vmpackc.even %vm811_vm7, %vm375_vm13 }
 0x122   : > { %v379_v32 = vsel %vm377_vm14, 16843009, %v671_v30 }
 0x123   : > { %381 = vst [vmem:[%s165_s30 + $0x8] sm:$0xff] %v379_v32 }
 0x124   : > { %622 = shalt.err (!%p619_p3)
}
 0x125   : > { %s623_s13 = scalar_lea.hbm %s821_s8, 256  ;;  %s627_s21 = scalar_lea.hbm %s870_s3, 512 }
 0x126   : > { %p624_p4 = scmp.ne.s32.totalorder %s821_s8, %s623_s13  ;;  %p628_p9 = scmp.lt.s32.totalorder %s821_s8, %s870_s3 }
 0x127   : > { %p629_p10 = scmp.lt.s32.totalorder %s627_s21, %s623_s13 }
 0x128   : > { %p625_p7 = pnand %p624_p4, %p736_p5 }
 0x129   : > { %p630_p11 = por %p629_p10, %p628_p9 }
 0x12a   : > { %p626_p8 = pneg %p625_p7 }
 0x12c   : > { %p631_p12 = pnand %p630_p11, %p626_p8 }
 0x12e   : > { %634 = shalt.err (!%p631_p12)
}
 0x12f   : > { %s673_s27 = smov 128   ;;  %s674_s28 = smov 8  }
 0x130   : > { %555 = dma.vmem_to_hbm [thread:$0]  (%p736_p5), %s816_s4, 256, %s821_s8, %s827_s0, %s673_s27, %s673_s27, %s674_s28  }
 0x131 PF: > { %p561_p13 = scmp.ge.s32.totalorder %s669_s17, 2  ;;  %s411_s29 = sand.u32 1, %s657_s14  }
 0x132   : > { %s412_s30 = scalar_lea.sflag [#allocation4], %s411_s29 }
 0x133   : > { %p558_p0 = pnand %p561_p13, %p740_p6 }
 0x135   : > { %p559_p1 = pneg %p558_p0 }
 0x137   : > { %652 = dma.done.wait (%p559_p1), %s412_s30, 256  }
 0x138   : > { %654 = vsyncadd (%p559_p1), %s412_s30, 4294967040  ;;  %p14_p2 = scmp.ge.s32.totalorder %s723_s19, 4   ;;  %s875_s14 = smov %s661_s15 }
 0x139   : > { %s876_s15 = smov %s665_s16  ;;  %s877_s16 = smov %s734_s22 }
 0x13a   : > { %s878_s17 = smov %s723_s19  ;;  %16 = sbr.rel (!%p14_p2) target bundleno = 5 (0x5), region = 67 }
 0x13f   :  { %417 = vsyncpa [#allocation4], 1 }
 0x140   :  { %419 = vsyncpa [#allocation4 + $0x1], 1 }

</bundles_post_ra>
